<compile_context>
chip_gen: v6e
topology: v6e:2x2x1
jax: 0.10.0
libtpu: 0.0.40
codegen_flags: <defaults>
</compile_context>

<pallas_src>
import functools

import jax
import jax.numpy as jnp
from jax.experimental import pallas as pl
from jax.experimental.pallas import tpu as pltpu


def _pretrain_head_kernel(emb_ref, w_ref, b_ref, out_ref):
    # emb_ref : (B, G, block_n, D)  native dtype -- G channels, one patch tile
    # w_ref   : (G, D, P)  bf16     -- these channels' weights (DMA'd once per group)
    # b_ref   : (G, 1, P)  f32      -- these channels' biases
    # out_ref : (B, G, block_n, P)
    Bb, G, Nb, D = emb_ref.shape
    P = w_ref.shape[-1]
    for gi in range(G):  # static unroll over folded channels (G small, <= 8)
        # Merge batch & patch dims into the MXU M dimension. Layout-preserving because
        # block_n % 16 == 0 or block_n == N. Cast to bf16 HERE (VPU, free vs DMA), not
        # in the wrapper, so the embedding is read from HBM exactly once at 4 B/elem.
        x = emb_ref[:, gi].reshape(Bb * Nb, D).astype(jnp.bfloat16)
        y = jnp.dot(x, w_ref[gi], preferred_element_type=jnp.float32)  # f32 MXU accum
        y = y + b_ref[gi]                      # (1, P) f32 bias, broadcast over rows
        y = jnp.maximum(y, 0.0)                # post_proj = ReLU (log_input=False)
        out_ref[:, gi] = y.reshape(Bb, Nb, P).astype(out_ref.dtype)


def _round_up(x: int, m: int) -> int:
    return (x + m - 1) // m * m


def _pick_vmem_limit_bytes() -> int:
    """Generation-aware scoped-VMEM limit: ~48 MiB on v7x (64 MiB physical),
    ~96 MiB on v5e/v6e (128 MiB physical). Conservative 48 MiB if query fails."""
    cap = None
    try:
        cap = int(pltpu.get_tpu_info().vmem_capacity_bytes)
    except Exception:
        cap = None
    if cap is None:
        return 48 * 1024 * 1024
    if cap <= 64 * 1024 * 1024:
        return 48 * 1024 * 1024
    return 96 * 1024 * 1024


def _step_vmem_bytes(B, bn, D, P, g, emb_itemsize, out_itemsize) -> int:
    """Double-buffered VMEM footprint of one grid step, with lane/sublane padding."""
    bn_pad = _round_up(bn, 16)        # sublane padding (covers bf16 pack=16)
    d_pad = _round_up(D, 128)
    p_pad = _round_up(P, 128)         # P<128 output block is lane-padded in VMEM (8x at P=16)
    emb = B * g * bn_pad * d_pad * emb_itemsize
    out = B * g * bn_pad * p_pad * out_itemsize
    wgt = g * _round_up(D, 16) * p_pad * 2 + g * 8 * p_pad * 4   # bf16 W + f32 bias
    return 2 * (emb + out + wgt)


def _auto_tiling(B, C, N, D, P, emb_itemsize, out_itemsize, budget_bytes):
    """Pick (channels-per-step group, patch tile block_n) under the VMEM budget."""
    divs_n = [d for d in range(N, 0, -1) if N % d == 0]          # descending
    bn_cands = [d for d in divs_n if d % 16 == 0]
    if N not in bn_cands:
        bn_cands = [N] + bn_cands        # full-N block is always layout-legal
    block_n = bn_cands[-1]               # fallback: smallest legal tile
    for bn in bn_cands:                  # biggest tile that fits the budget
        if _step_vmem_bytes(B, bn, D, P, 1, emb_itemsize, out_itemsize) <= budget_bytes:
            block_n = bn
            break
    # Fold channels until per-step input DMA reaches ~0.5 MiB (amortizes the
    # ~0.35 us/step grid overhead) or the budget is exhausted. Cap unroll at 8.
    target_in_bytes = 512 * 1024
    group = 1
    for g in [d for d in range(1, min(C, 8) + 1) if C % d == 0]:   # ascending
        if _step_vmem_bytes(B, block_n, D, P, g, emb_itemsize, out_itemsize) > budget_bytes:
            break
        group = g
        if B * g * block_n * D * emb_itemsize >= target_in_bytes:
            break
    return group, block_n


@functools.partial(jax.jit, static_argnames=("block_n", "group", "out_dtype"))
def pretrain_head(
    embedding: jax.Array,      # (B, C, N, D)
    weights: jax.Array,        # (C, D, P)  per-channel projection weights
    biases: jax.Array,         # (C, P)     per-channel projection biases
    *,
    block_n: int | None = None,   # patch tile; must divide N and be %16==0 (or == N)
    group: int | None = None,     # channels folded per grid step; must divide C
    out_dtype=None,               # e.g. jnp.bfloat16 to halve output writeback bytes
) -> jax.Array:
    B, C, N, D = embedding.shape
    Cw, Dw, P = weights.shape
    assert (C, D) == (Cw, Dw), "weights must be (C, D, P) matching embedding (B, C, N, D)"
    assert biases.shape == (C, P)

    out_dtype = embedding.dtype if out_dtype is None else jnp.dtype(out_dtype)

    vmem_limit = _pick_vmem_limit_bytes()
    budget = int(0.8 * vmem_limit)        # headroom for Mosaic internal scratch

    auto_group, auto_block_n = _auto_tiling(
        B, C, N, D, P, embedding.dtype.itemsize, out_dtype.itemsize, budget)
    if block_n is None:
        block_n = auto_block_n
    if group is None:
        group = auto_group

    assert N % block_n == 0, "block_n must divide num_patches (no ragged grid / masking)"
    assert block_n == N or block_n % 16 == 0, \
        "block_n must be a multiple of 16 (layout-preserving (B,bn,D)->(B*bn,D) merge)"
    assert C % group == 0, "group must divide num_input_channels"
    n_tiles = N // block_n

    # Weights are tiny (C*D*P) -> wrapper cast to bf16 is negligible HBM traffic and
    # avoids a per-step in-kernel cast. Bias stays f32 for the epilogue (safe on v5e
    # which has no bf16 VALU). The EMBEDDING is passed in its native dtype on purpose.
    w_c = weights.astype(jnp.bfloat16)
    b_c = biases.astype(jnp.float32).reshape(C, 1, P)

    return pl.pallas_call(
        _pretrain_head_kernel,
        out_shape=jax.ShapeDtypeStruct((B, C, N, P), out_dtype),
        grid_spec=pltpu.PrefetchScalarGridSpec(
            num_scalar_prefetch=0,
            grid=(C // group, n_tiles),   # channel groups outer, patch tiles inner
            in_specs=[
                # all batches of `group` channels, one patch tile (native dtype, no wrapper cast)
                pl.BlockSpec((B, group, block_n, D), lambda g, n: (0, g, n, 0)),
                # per-group weight/bias: block index constant across inner axis -> one DMA
                pl.BlockSpec((group, D, P), lambda g, n: (g, 0, 0)),
                pl.BlockSpec((group, 1, P), lambda g, n: (g, 0, 0)),
            ],
            out_specs=pl.BlockSpec((B, group, block_n, P), lambda g, n: (0, g, n, 0)),
        ),
        compiler_params=pltpu.CompilerParams(
            # Both grid axes are independent (no accumulation / revisited outputs).
            # TODO(synk): verify 2-TC sharding of the channel axis on v7x (CORE_PARALLEL if not).
            dimension_semantics=("parallel", "parallel"),
            vmem_limit_bytes=vmem_limit,
        ),
    )(embedding, w_c, b_c)


def _reference(embedding, weights, biases, out_dtype=None):
    # Pure-JAX reference matching the kernel's deliberate numerics: bf16 matmul
    # operands, f32 accumulation, f32 bias + ReLU epilogue.
    out_dtype = embedding.dtype if out_dtype is None else out_dtype
    e = embedding.astype(jnp.bfloat16).astype(jnp.float32)
    w = weights.astype(jnp.bfloat16).astype(jnp.float32)
    y = jnp.einsum("bcnd,cdp->bcnp", e, w, precision=jax.lax.Precision.HIGHEST)
    y = y + biases.astype(jnp.float32)[None, :, None, :]
    return jnp.maximum(y, 0.0).astype(out_dtype)


if __name__ == "__main__":
    # Small shapes consistent with the module's forward.
    B, C, N, D, P = 2, 4, 8, 32, 16   # batch, channels, num_patches, d_model, patch_length

    key = jax.random.PRNGKey(0)
    k_emb, k_w, k_b = jax.random.split(key, 3)

    embedding = jax.random.normal(k_emb, (B, C, N, D), dtype=jnp.float32)
    # Deterministic synthetic parameters (stand-in for nn.Linear per channel).
    weights = jax.random.normal(k_w, (C, D, P), dtype=jnp.float32) * 0.1
    biases = jax.random.normal(k_b, (C, P), dtype=jnp.float32) * 0.1

    out = pretrain_head(embedding, weights, biases)
    out = jax.block_until_ready(out)

    ref = _reference(embedding, weights, biases)
    assert out.shape == (B, C, N, P)
    assert jnp.allclose(out, ref, atol=1e-2, rtol=1e-2), "mismatch vs reference"

    print("KERNEL_OK")
</pallas_src>

<mosaic_0001>
module attributes {stable_mosaic.version = 11 : i64} {
  func.func @_pretrain_head_kernel(%arg0: i32, %arg1: i32, %arg2: memref<2x4x8x32xf32, #tpu.memory_space<vmem>>, %arg3: memref<4x32x16xbf16, #tpu.memory_space<vmem>>, %arg4: memref<4x1x16xf32, #tpu.memory_space<vmem>>, %arg5: memref<2x4x8x16xf32, #tpu.memory_space<vmem>>) attributes {dimension_semantics = [#tpu.dimension_semantics<parallel>, #tpu.dimension_semantics<parallel>], iteration_bounds = array<i64: 1, 1>, scalar_prefetch = 0 : i64, scratch_operands = 0 : i64, tpu.core_type = #tpu.core_type<tc>, window_params = [{transform_indices = @transform_0, window_bounds = array<i64: 2, 4, 8, 32>}, {transform_indices = @transform_1, window_bounds = array<i64: 4, 32, 16>}, {transform_indices = @transform_2, window_bounds = array<i64: 4, 1, 16>}, {transform_indices = @transform_3, window_bounds = array<i64: 2, 4, 8, 16>}]} {
    %c0 = arith.constant 0 : index
    %c0_0 = arith.constant 0 : index
    %c0_1 = arith.constant 0 : index
    %c0_2 = arith.constant 0 : index
    %0 = vector.load %arg2[%c0, %c0_0, %c0_1, %c0_2] : memref<2x4x8x32xf32, #tpu.memory_space<vmem>>, vector<2x1x8x32xf32>
    %1 = vector.shape_cast %0 : vector<2x1x8x32xf32> to vector<2x8x32xf32>
    %2 = vector.shape_cast %1 : vector<2x8x32xf32> to vector<16x32xf32>
    %3 = arith.truncf %2 : vector<16x32xf32> to vector<16x32xbf16>
    %c0_3 = arith.constant 0 : index
    %c0_4 = arith.constant 0 : index
    %c0_5 = arith.constant 0 : index
    %4 = vector.load %arg3[%c0_3, %c0_4, %c0_5] : memref<4x32x16xbf16, #tpu.memory_space<vmem>>, vector<1x32x16xbf16>
    %5 = vector.shape_cast %4 : vector<1x32x16xbf16> to vector<32x16xbf16>
    %cst = arith.constant dense<0.000000e+00> : vector<16x16xf32>
    %6 = tpu.matmul %3, %5, %cst {dimension_numbers = #tpu.dot_dimension_numbers<[1], [0], [0], [1], [0, 0, 1, 1], [], []>} : vector<16x32xbf16>, vector<32x16xbf16>, vector<16x16xf32> -> vector<16x16xf32>
    %c0_6 = arith.constant 0 : index
    %c0_7 = arith.constant 0 : index
    %c0_8 = arith.constant 0 : index
    %7 = vector.load %arg4[%c0_6, %c0_7, %c0_8] : memref<4x1x16xf32, #tpu.memory_space<vmem>>, vector<1x1x16xf32>
    %8 = vector.shape_cast %7 : vector<1x1x16xf32> to vector<1x16xf32>
    %9 = vector.broadcast %8 : vector<1x16xf32> to vector<16x16xf32>
    %10 = arith.addf %6, %9 : vector<16x16xf32>
    %cst_9 = arith.constant 0.000000e+00 : f32
    %11 = vector.broadcast %cst_9 : f32 to vector<16x16xf32>
    %12 = arith.maximumf %10, %11 : vector<16x16xf32>
    %13 = vector.shape_cast %12 : vector<16x16xf32> to vector<2x8x16xf32>
    %c0_10 = arith.constant 0 : index
    %c0_11 = arith.constant 0 : index
    %c0_12 = arith.constant 0 : index
    %c0_13 = arith.constant 0 : index
    %14 = vector.load %arg5[%c0_10, %c0_11, %c0_12, %c0_13] : memref<2x4x8x16xf32, #tpu.memory_space<vmem>>, vector<2x1x8x16xf32>
    %15 = vector.shape_cast %14 : vector<2x1x8x16xf32> to vector<2x8x16xf32>
    %16 = vector.shape_cast %13 : vector<2x8x16xf32> to vector<2x1x8x16xf32>
    tpu.vector_store %arg5[%c0_10, %c0_11, %c0_12, %c0_13], %16 {strides = array<i32>} : memref<2x4x8x16xf32, #tpu.memory_space<vmem>>, vector<2x1x8x16xf32>,
    %c0_14 = arith.constant 0 : index
    %c1 = arith.constant 1 : index
    %c0_15 = arith.constant 0 : index
    %c0_16 = arith.constant 0 : index
    %17 = vector.load %arg2[%c0_14, %c1, %c0_15, %c0_16] : memref<2x4x8x32xf32, #tpu.memory_space<vmem>>, vector<2x1x8x32xf32>
    %18 = vector.shape_cast %17 : vector<2x1x8x32xf32> to vector<2x8x32xf32>
    %19 = vector.shape_cast %18 : vector<2x8x32xf32> to vector<16x32xf32>
    %20 = arith.truncf %19 : vector<16x32xf32> to vector<16x32xbf16>
    %c1_17 = arith.constant 1 : index
    %c0_18 = arith.constant 0 : index
    %c0_19 = arith.constant 0 : index
    %21 = vector.load %arg3[%c1_17, %c0_18, %c0_19] : memref<4x32x16xbf16, #tpu.memory_space<vmem>>, vector<1x32x16xbf16>
    %22 = vector.shape_cast %21 : vector<1x32x16xbf16> to vector<32x16xbf16>
    %cst_20 = arith.constant dense<0.000000e+00> : vector<16x16xf32>
    %23 = tpu.matmul %20, %22, %cst_20 {dimension_numbers = #tpu.dot_dimension_numbers<[1], [0], [0], [1], [0, 0, 1, 1], [], []>} : vector<16x32xbf16>, vector<32x16xbf16>, vector<16x16xf32> -> vector<16x16xf32>
    %c1_21 = arith.constant 1 : index
    %c0_22 = arith.constant 0 : index
    %c0_23 = arith.constant 0 : index
    %24 = vector.load %arg4[%c1_21, %c0_22, %c0_23] : memref<4x1x16xf32, #tpu.memory_space<vmem>>, vector<1x1x16xf32>
    %25 = vector.shape_cast %24 : vector<1x1x16xf32> to vector<1x16xf32>
    %26 = vector.broadcast %25 : vector<1x16xf32> to vector<16x16xf32>
    %27 = arith.addf %23, %26 : vector<16x16xf32>
    %cst_24 = arith.constant 0.000000e+00 : f32
    %28 = vector.broadcast %cst_24 : f32 to vector<16x16xf32>
    %29 = arith.maximumf %27, %28 : vector<16x16xf32>
    %30 = vector.shape_cast %29 : vector<16x16xf32> to vector<2x8x16xf32>
    %c0_25 = arith.constant 0 : index
    %c1_26 = arith.constant 1 : index
    %c0_27 = arith.constant 0 : index
    %c0_28 = arith.constant 0 : index
    %31 = vector.load %arg5[%c0_25, %c1_26, %c0_27, %c0_28] : memref<2x4x8x16xf32, #tpu.memory_space<vmem>>, vector<2x1x8x16xf32>
    %32 = vector.shape_cast %31 : vector<2x1x8x16xf32> to vector<2x8x16xf32>
    %33 = vector.shape_cast %30 : vector<2x8x16xf32> to vector<2x1x8x16xf32>
    tpu.vector_store %arg5[%c0_25, %c1_26, %c0_27, %c0_28], %33 {strides = array<i32>} : memref<2x4x8x16xf32, #tpu.memory_space<vmem>>, vector<2x1x8x16xf32>,
    %c0_29 = arith.constant 0 : index
    %c2 = arith.constant 2 : index
    %c0_30 = arith.constant 0 : index
    %c0_31 = arith.constant 0 : index
    %34 = vector.load %arg2[%c0_29, %c2, %c0_30, %c0_31] : memref<2x4x8x32xf32, #tpu.memory_space<vmem>>, vector<2x1x8x32xf32>
    %35 = vector.shape_cast %34 : vector<2x1x8x32xf32> to vector<2x8x32xf32>
    %36 = vector.shape_cast %35 : vector<2x8x32xf32> to vector<16x32xf32>
    %37 = arith.truncf %36 : vector<16x32xf32> to vector<16x32xbf16>
    %c2_32 = arith.constant 2 : index
    %c0_33 = arith.constant 0 : index
    %c0_34 = arith.constant 0 : index
    %38 = vector.load %arg3[%c2_32, %c0_33, %c0_34] : memref<4x32x16xbf16, #tpu.memory_space<vmem>>, vector<1x32x16xbf16>
    %39 = vector.shape_cast %38 : vector<1x32x16xbf16> to vector<32x16xbf16>
    %cst_35 = arith.constant dense<0.000000e+00> : vector<16x16xf32>
    %40 = tpu.matmul %37, %39, %cst_35 {dimension_numbers = #tpu.dot_dimension_numbers<[1], [0], [0], [1], [0, 0, 1, 1], [], []>} : vector<16x32xbf16>, vector<32x16xbf16>, vector<16x16xf32> -> vector<16x16xf32>
    %c2_36 = arith.constant 2 : index
    %c0_37 = arith.constant 0 : index
    %c0_38 = arith.constant 0 : index
    %41 = vector.load %arg4[%c2_36, %c0_37, %c0_38] : memref<4x1x16xf32, #tpu.memory_space<vmem>>, vector<1x1x16xf32>
    %42 = vector.shape_cast %41 : vector<1x1x16xf32> to vector<1x16xf32>
    %43 = vector.broadcast %42 : vector<1x16xf32> to vector<16x16xf32>
    %44 = arith.addf %40, %43 : vector<16x16xf32>
    %cst_39 = arith.constant 0.000000e+00 : f32
    %45 = vector.broadcast %cst_39 : f32 to vector<16x16xf32>
    %46 = arith.maximumf %44, %45 : vector<16x16xf32>
    %47 = vector.shape_cast %46 : vector<16x16xf32> to vector<2x8x16xf32>
    %c0_40 = arith.constant 0 : index
    %c2_41 = arith.constant 2 : index
    %c0_42 = arith.constant 0 : index
    %c0_43 = arith.constant 0 : index
    %48 = vector.load %arg5[%c0_40, %c2_41, %c0_42, %c0_43] : memref<2x4x8x16xf32, #tpu.memory_space<vmem>>, vector<2x1x8x16xf32>
    %49 = vector.shape_cast %48 : vector<2x1x8x16xf32> to vector<2x8x16xf32>
    %50 = vector.shape_cast %47 : vector<2x8x16xf32> to vector<2x1x8x16xf32>
    tpu.vector_store %arg5[%c0_40, %c2_41, %c0_42, %c0_43], %50 {strides = array<i32>} : memref<2x4x8x16xf32, #tpu.memory_space<vmem>>, vector<2x1x8x16xf32>,
    %c0_44 = arith.constant 0 : index
    %c3 = arith.constant 3 : index
    %c0_45 = arith.constant 0 : index
    %c0_46 = arith.constant 0 : index
    %51 = vector.load %arg2[%c0_44, %c3, %c0_45, %c0_46] : memref<2x4x8x32xf32, #tpu.memory_space<vmem>>, vector<2x1x8x32xf32>
    %52 = vector.shape_cast %51 : vector<2x1x8x32xf32> to vector<2x8x32xf32>
    %53 = vector.shape_cast %52 : vector<2x8x32xf32> to vector<16x32xf32>
    %54 = arith.truncf %53 : vector<16x32xf32> to vector<16x32xbf16>
    %c3_47 = arith.constant 3 : index
    %c0_48 = arith.constant 0 : index
    %c0_49 = arith.constant 0 : index
    %55 = vector.load %arg3[%c3_47, %c0_48, %c0_49] : memref<4x32x16xbf16, #tpu.memory_space<vmem>>, vector<1x32x16xbf16>
    %56 = vector.shape_cast %55 : vector<1x32x16xbf16> to vector<32x16xbf16>
    %cst_50 = arith.constant dense<0.000000e+00> : vector<16x16xf32>
    %57 = tpu.matmul %54, %56, %cst_50 {dimension_numbers = #tpu.dot_dimension_numbers<[1], [0], [0], [1], [0, 0, 1, 1], [], []>} : vector<16x32xbf16>, vector<32x16xbf16>, vector<16x16xf32> -> vector<16x16xf32>
    %c3_51 = arith.constant 3 : index
    %c0_52 = arith.constant 0 : index
    %c0_53 = arith.constant 0 : index
    %58 = vector.load %arg4[%c3_51, %c0_52, %c0_53] : memref<4x1x16xf32, #tpu.memory_space<vmem>>, vector<1x1x16xf32>
    %59 = vector.shape_cast %58 : vector<1x1x16xf32> to vector<1x16xf32>
    %60 = vector.broadcast %59 : vector<1x16xf32> to vector<16x16xf32>
    %61 = arith.addf %57, %60 : vector<16x16xf32>
    %cst_54 = arith.constant 0.000000e+00 : f32
    %62 = vector.broadcast %cst_54 : f32 to vector<16x16xf32>
    %63 = arith.maximumf %61, %62 : vector<16x16xf32>
    %64 = vector.shape_cast %63 : vector<16x16xf32> to vector<2x8x16xf32>
    %c0_55 = arith.constant 0 : index
    %c3_56 = arith.constant 3 : index
    %c0_57 = arith.constant 0 : index
    %c0_58 = arith.constant 0 : index
    %65 = vector.load %arg5[%c0_55, %c3_56, %c0_57, %c0_58] : memref<2x4x8x16xf32, #tpu.memory_space<vmem>>, vector<2x1x8x16xf32>
    %66 = vector.shape_cast %65 : vector<2x1x8x16xf32> to vector<2x8x16xf32>
    %67 = vector.shape_cast %64 : vector<2x8x16xf32> to vector<2x1x8x16xf32>
    tpu.vector_store %arg5[%c0_55, %c3_56, %c0_57, %c0_58], %67 {strides = array<i32>} : memref<2x4x8x16xf32, #tpu.memory_space<vmem>>, vector<2x1x8x16xf32>,
    return
  }
  func.func @transform_0(%arg0: i32, %arg1: i32) -> (i32, i32, i32, i32) {
    %c0_i32 = arith.constant 0 : i32
    %c0_i32_0 = arith.constant 0 : i32
    %c0_i32_1 = arith.constant 0 : i32
    return %c0_i32, %arg0, %arg1, %c0_i32_0 : i32, i32, i32, i32
  }
  func.func @transform_1(%arg0: i32, %arg1: i32) -> (i32, i32, i32) {
    %c0_i32 = arith.constant 0 : i32
    %c0_i32_0 = arith.constant 0 : i32
    %c0_i32_1 = arith.constant 0 : i32
    return %arg0, %c0_i32, %c0_i32_0 : i32, i32, i32
  }
  func.func @transform_2(%arg0: i32, %arg1: i32) -> (i32, i32, i32) {
    %c0_i32 = arith.constant 0 : i32
    %c0_i32_0 = arith.constant 0 : i32
    %c0_i32_1 = arith.constant 0 : i32
    return %arg0, %c0_i32, %c0_i32_0 : i32, i32, i32
  }
  func.func @transform_3(%arg0: i32, %arg1: i32) -> (i32, i32, i32, i32) {
    %c0_i32 = arith.constant 0 : i32
    %c0_i32_0 = arith.constant 0 : i32
    %c0_i32_1 = arith.constant 0 : i32
    return %c0_i32, %arg0, %arg1, %c0_i32_0 : i32, i32, i32, i32
  }
}

</mosaic_0001>

<bundles_post_ra>
// kernel: pretrain_head.1
= control target key start
LH: loop header
LB: loop body
LE: loop exit
PB: predicated region body
PF: predicated region fallthrough
CT: control target
= control target key end

     0   :  { %v458_v1 = vmov 0.0   ;;  %vm459_vm0 = vmmov 0   ;;  %vm42_vm1 = vcmask 261120   ;;  %s562_s0 = inlined_call_operand.vmem [shape: f32[2,4,8,32], index: 0, kind: input, shape index: {}]   ;;  %s563_s1 = inlined_call_operand.vmem [shape: bf16[4,32,16], index: 1, kind: input, shape index: {}]   ;;  %s564_s2 = inlined_call_operand.vmem [shape: f32[4,1,16], index: 2, kind: input, shape index: {}]   ;;  %s565_s3 = inlined_call_operand.hbm [shape: f32[2,4,8,16], index: 3, kind: output, shape index: {}]  }
   0x1   :  { %v428_v0 = vld [vmem:[%s563_s1 + $0x8] sm:$0xff]   ;;  %391 = vmatprep.subr.bf16.mxu0 %v458_v1  ;;  %399 = vmatprep.subr.bf16.mxu1 %v458_v1  ;;  %v429_v2 = vld [vmem:[%s563_s1 + $0x18] sm:$0xff]   ;;  %v430_v3 = vld [vmem:[%s563_s1] sm:$0xff]  }
   0x2   :  { %392 = vmatpush3.bf16.msra.mxu0 %v428_v0  ;;  %395 = vmatprep.mubr.msk.bf16.mxu0 %vm459_vm0, %v458_v1  ;;  %v431_v4 = vld [vmem:[%s563_s1 + $0x10] sm:$0xff]   ;;  %v16_v5 = vld [vmem:[%s562_s0] sm:$0xff]  ;;  %v346_v7 = vld [vmem:[%s562_s0 + $0x8] sm:$0xff] }
   0x3   :  { %400 = vmatpush3.bf16.msra.mxu1 %v429_v2  ;;  %393 = vmatprep.subr.bf16.mxu0 %v458_v1  ;;  %v17_v6 = vld [vmem:[%s562_s0 + $0x20] sm:$0xff]  ;;  %v347_v9 = vld [vmem:[%s562_s0 + $0x28] sm:$0xff]  ;;  %v433_v12 = vld [vmem:[%s563_s1 + $0x38] sm:$0xff]  }
   0x4   :  { %401 = vmatprep.subr.bf16.mxu1 %v458_v1  ;;  %403 = vmatprep.mubr.msk.bf16.mxu1 %vm459_vm0, %v458_v1  ;;  %v18_v8 = vpack.c.bf16 %v17_v6, %v16_v5  ;;  %v95_v10 = vpack.c.bf16 %v347_v9, %v346_v7  ;;  %v432_v11 = vld [vmem:[%s563_s1 + $0x28] sm:$0xff]   ;;  %v434_v13 = vld [vmem:[%s563_s1 + $0x20] sm:$0xff]   ;;  %v435_v14 = vld [vmem:[%s563_s1 + $0x30] sm:$0xff]  }
   0x5   :  { %v357_v15 = vld [vmem:[%s562_s0 + $0x10] sm:$0xff]  ;;  %v368_v17 = vld [vmem:[%s562_s0 + $0x18] sm:$0xff] }
   0x6   :  { %394 = vmatpush3.bf16.msra.mxu0 %v430_v3  ;;  %v358_v16 = vld [vmem:[%s562_s0 + $0x30] sm:$0xff]  ;;  %v369_v18 = vld [vmem:[%s562_s0 + $0x38] sm:$0xff] }
   0x7   :  { %402 = vmatpush3.bf16.msra.mxu1 %v431_v4  ;;  %407 = vmatprep.subr.bf16.mxu0 %v458_v1 }
   0x8   :  { %415 = vmatprep.subr.bf16.mxu1 %v458_v1 }
   0x9   :  { %396 = vmatmul.mubr.msk.bf16.vlgmr.msra.gmra.mxu0 %vm42_vm1, %v18_v8 }
   0xa   :  { %404 = vmatmul.mubr.msk.bf16.vlgmr.msra.gmra.mxu1 %vm42_vm1, %v95_v10  ;;  %408 = vmatpush3.bf16.msra.mxu0 %v432_v11 }
   0xb   :  { %416 = vmatpush3.bf16.msra.mxu1 %v433_v12  ;;  %409 = vmatprep.subr.bf16.mxu0 %v458_v1 }
   0xc   :  { %8 = vsyncpa [#allocation3], 0  ;;  %417 = vmatprep.subr.bf16.mxu1 %v458_v1  ;;  %411 = vmatprep.mubr.msk.bf16.mxu0 %vm459_vm0, %v458_v1  ;;  %v173_v19 = vpack.c.bf16 %v358_v16, %v357_v15  ;;  %v251_v20 = vpack.c.bf16 %v369_v18, %v368_v17  ;;  %v342_v21 = vld [vmem:[%s564_s2] ss:$0 sm:$0xff]  ;;  %v353_v22 = vld [vmem:[%s564_s2 + $0x1] ss:$0 sm:$0xff] }
   0xd   :  { %419 = vmatprep.mubr.msk.bf16.mxu1 %vm459_vm0, %v458_v1  ;;  %vm89_vm2 = vcmask 130048   ;;  %v364_v36 = vld [vmem:[%s564_s2 + $0x2] ss:$0 sm:$0xff]  ;;  %v375_v39 = vld [vmem:[%s564_s2 + $0x3] ss:$0 sm:$0xff]  ;;  %s460_s23 = smov [#allocation2]  }
   0xe   :  { %410 = vmatpush3.bf16.msra.mxu0 %v434_v13  ;;  %s331_s24 = sshll.u32 %s460_s23, 4  ;;  %s332_s24 = int_to_ptr.vmem [resolvable:$true] %s331_s24 }
   0xf   :  { %418 = vmatpush3.bf16.msra.mxu1 %v435_v14  ;;  %s436_s2 = scalar_lea.vmem %s332_s24, 1024  ;;  %p441_p1 = scmp.lt.s32.totalorder %s332_s24, %s332_s24 }
  0x10   :  { %p437_p0 = scmp.ne.s32.totalorder %s332_s24, %s436_s2  ;;  %p442_p2 = scmp.lt.s32.totalorder %s436_s2, %s436_s2 }
  0x11   :  { %412 = vmatmul.mubr.msk.bf16.vlgmr.msra.gmra.mxu0 %vm42_vm1, %v173_v19 }
  0x12   :  { %420 = vmatmul.mubr.msk.bf16.vlgmr.msra.gmra.mxu1 %vm42_vm1, %v251_v20  ;;  %p443_p3 = por %p442_p2, %p441_p1 }
  0x14   :  { %p444_p4 = pnand %p443_p3, %p437_p0 }
  0xc9   :  { %v80_v23 = vpop.f32.mrf.mxu0 }
  0xca   :  { %v81_v24 = vadd.f32 %v342_v21, %v80_v23  ;;  %v158_v25 = vpop.f32.mrf.mxu1 }
  0xcb   :  { %v159_v26 = vadd.f32 %v353_v22, %v158_v25  ;;  %v397_v27 = vpop.f32.mrf.mxu0 }
  0xcc   :  { %v87_v28 = vmax.f32 %v81_v24, 0.0  ;;  %v405_v29 = vpop.f32.mrf.mxu1 }
  0xcd   :  { %v165_v30 = vmax.f32 %v159_v26, 0.0  ;;  %v83_v31 = vpop.f32.mrf.mxu0 }
  0xce   :  { %90 = vst.msk [vmem:[#allocation2] sm:$0xff] %vm89_vm2, %v87_v28  ;;  %v84_v32 = vadd.f32 %v342_v21, %v83_v31  ;;  %v161_v33 = vpop.f32.mrf.mxu1 }
  0xcf   :  { %168 = vst.msk [vmem:[#allocation2 + $0x8] sm:$0xff] %vm89_vm2, %v165_v30  ;;  %v162_v34 = vadd.f32 %v353_v22, %v161_v33  ;;  %v398_v35 = vpop.f32.mrf.mxu0 }
  0xd0   :  { %v88_v37 = vmax.f32 %v84_v32, 0.0  ;;  %v406_v38 = vpop.f32.mrf.mxu1 }
  0xd1   :  { %v166_v40 = vmax.f32 %v162_v34, 0.0  ;;  %v236_v41 = vpop.f32.mrf.mxu0 }
  0xd2   :  { %91 = vst.msk [vmem:[#allocation2 + $0x20] sm:$0xff] %vm89_vm2, %v88_v37  ;;  %v237_v42 = vadd.f32 %v364_v36, %v236_v41  ;;  %v314_v43 = vpop.f32.mrf.mxu1 }
  0xd3   :  { %169 = vst.msk [vmem:[#allocation2 + $0x28] sm:$0xff] %vm89_vm2, %v166_v40  ;;  %v315_v44 = vadd.f32 %v375_v39, %v314_v43  ;;  %v413_v45 = vpop.f32.mrf.mxu0 }
  0xd4   :  { %v243_v46 = vmax.f32 %v237_v42, 0.0  ;;  %v421_v47 = vpop.f32.mrf.mxu1 }
  0xd5   :  { %v321_v48 = vmax.f32 %v315_v44, 0.0  ;;  %v239_v49 = vpop.f32.mrf.mxu0 }
  0xd6   :  { %246 = vst.msk [vmem:[#allocation2 + $0x10] sm:$0xff] %vm89_vm2, %v243_v46  ;;  %v240_v50 = vadd.f32 %v364_v36, %v239_v49  ;;  %v317_v51 = vpop.f32.mrf.mxu1 }
  0xd7   :  { %324 = vst.msk [vmem:[#allocation2 + $0x18] sm:$0xff] %vm89_vm2, %v321_v48  ;;  %v318_v52 = vadd.f32 %v375_v39, %v317_v51  ;;  %v414_v53 = vpop.f32.mrf.mxu0 }
  0xd8   :  { %v244_v54 = vmax.f32 %v240_v50, 0.0  ;;  %v422_v55 = vpop.f32.mrf.mxu1 }
  0xd9   :  { %v322_v56 = vmax.f32 %v318_v52, 0.0 }
  0xda   :  { %247 = vst.msk [vmem:[#allocation2 + $0x30] sm:$0xff] %vm89_vm2, %v244_v54 }
  0xdb   :  { %325 = vst.msk [vmem:[#allocation2 + $0x38] sm:$0xff] %vm89_vm2, %v322_v56 }
  0xdc   :  { %447 = shalt.err (!%p444_p4)
}
  0xdd   :  { %s461_s25 = smov 128   ;;  %s462_s26 = smov 8  }
  0xde   :  { %337 = dma.vmem_to_hbm [thread:$0]  %s332_s24, 1024, %s565_s3, [#allocation3], %s461_s25, %s461_s25, %s462_s26  }
  0xdf   :  { %456 = dma.done.wait [#allocation3], 1024  }
  0xe0   :  { %457 = vsyncadd [#allocation3], 4294966272 }
  0xe1   :  { %341 = vsyncpa [#allocation3], 1 }

</bundles_post_ra>
